<compile_context>
chip_gen: v5e
topology: v5e:2x2
jax: 0.10.0
libtpu: 0.0.40
codegen_flags: <defaults>
</compile_context>

<pallas_src>
import functools

import jax
import jax.numpy as jnp
from jax import lax
from jax.experimental import pallas as pl
from jax.experimental.pallas import tpu as pltpu

ALPHA = 1.0
GAMMA = 2.0  # statically 2 -> use an explicit square in the kernel


def focal_loss_kernel(logits_ref, targets_ref, out_ref, acc_ref, *, n_total):
    # logits_ref: (TILE_N, C) native dtype; targets_ref: (TILE_N, 1) int32
    # out_ref:    (1, 1) f32 (resident across the whole grid)
    # acc_ref:    (1, 1) f32 VMEM scratch accumulator
    pid = pl.program_id(0)

    @pl.when(pid == 0)
    def _init():
        acc_ref[...] = jnp.zeros_like(acc_ref)

    x = logits_ref[...].astype(jnp.float32)     # cast in VMEM (free under DMA)
    tgt = targets_ref[...]                      # (TILE_N, 1) int32
    tile_n, c = x.shape

    # ---- cross_entropy(inputs, targets, reduction='none') ----
    # numerically-stable log-softmax
    row_max = jnp.max(x, axis=-1, keepdims=True)                      # (T, 1)
    shifted = x - row_max                                             # (T, C)
    lse = jnp.log(jnp.sum(jnp.exp(shifted), axis=-1, keepdims=True))  # (T, 1)

    # gather target-class logit via one-hot mask (no dynamic gather on TPU)
    col_ids = lax.broadcasted_iota(jnp.int32, (tile_n, c), 1)         # (T, C)
    tgt_shifted = jnp.sum(jnp.where(col_ids == tgt, shifted, 0.0),
                          axis=-1, keepdims=True)                     # (T, 1)

    ce = lse - tgt_shifted                                            # (T, 1)

    # ---- focal modulation: alpha * (1 - pt)^2 * ce, gamma == 2 ----
    pt = jnp.exp(-ce)
    q = 1.0 - pt
    focal = ALPHA * q * q * ce                                        # (T, 1)

    # mask rows past the true batch size (last, possibly partial, tile)
    row_ids = lax.broadcasted_iota(jnp.int32, (tile_n, 1), 0) + pid * tile_n
    focal = jnp.where(row_ids < n_total, focal, 0.0)

    acc_ref[...] += jnp.sum(focal, keepdims=True)                     # (1, 1)

    # ---- reduction == 'mean': write the output exactly once ----
    @pl.when(pid == pl.num_programs(0) - 1)
    def _finalize():
        out_ref[...] = acc_ref[...] / jnp.float32(n_total)


def _pick_tile_n(n, c, itemsize):
    # Cap each logits buffer at ~2 MiB; with 2 inputs x 2 pipeline buffers this
    # stays well under the 32 MiB scoped-VMEM default on every generation
    # (including v7x's 64 MiB physical VMEM).
    budget_bytes = 2 * 1024 * 1024
    rows = max(8, budget_bytes // max(1, c * itemsize))
    tile = min(n, rows, 1024)
    if tile < n:
        tile = max(8, (tile // 8) * 8)  # f32 sublane alignment
    return tile


def focal_loss(logits, targets):
    """logits: (N, C) float (any dtype); targets: (N,) int class ids -> scalar f32."""
    n, c = logits.shape
    targets2d = targets.astype(jnp.int32).reshape(n, 1)

    tile_n = _pick_tile_n(n, c, logits.dtype.itemsize)
    num_tiles = pl.cdiv(n, tile_n)

    kernel = functools.partial(focal_loss_kernel, n_total=n)

    cost = pl.CostEstimate(
        flops=8 * n * c,
        transcendentals=n * c + n,          # exp over logits + exp(-ce)
        bytes_accessed=n * c * logits.dtype.itemsize + n * 4 + 4,
    )

    out = pl.pallas_call(
        kernel,
        out_shape=jax.ShapeDtypeStruct((1, 1), jnp.float32),
        grid_spec=pltpu.PrefetchScalarGridSpec(
            num_scalar_prefetch=0,
            grid=(num_tiles,),
            in_specs=[
                pl.BlockSpec((tile_n, c), lambda i: (i, 0)),
                pl.BlockSpec((tile_n, 1), lambda i: (i, 0)),
            ],
            out_specs=pl.BlockSpec((1, 1), lambda i: (0, 0)),
            scratch_shapes=[pltpu.VMEM((1, 1), jnp.float32)],
        ),
        compiler_params=pltpu.CompilerParams(
            dimension_semantics=("arbitrary",),   # reduction axis over N
            vmem_limit_bytes=32 * 1024 * 1024,
        ),
        cost_estimate=cost,
    )(logits, targets2d)   # NOTE: no wrapper-side astype; cast happens in VMEM
    return out[0, 0]


if __name__ == "__main__":
    key = jax.random.PRNGKey(0)
    k_logits, k_tgt = jax.random.split(key)

    N, C = 8, 32  # small (batch, num_classes) consistent with F.cross_entropy
    logits = jax.random.normal(k_logits, (N, C), dtype=jnp.float32)
    targets = jax.random.randint(k_tgt, (N,), 0, C, dtype=jnp.int32)

    loss = focal_loss(logits, targets)
    jax.block_until_ready(loss)
    print("KERNEL_OK")
</pallas_src>

<mosaic_0001>
module attributes {stable_mosaic.version = 11 : i64} {
  func.func @focal_loss_kernel(%arg0: i32, %arg1: memref<8x32xf32, #tpu.memory_space<vmem>>, %arg2: memref<8x1xi32, #tpu.memory_space<vmem>>, %arg3: memref<1x1xf32, #tpu.memory_space<vmem>>, %arg4: memref<1x1xf32, #tpu.memory_space<vmem>>) attributes {dimension_semantics = [#tpu.dimension_semantics<arbitrary>], iteration_bounds = array<i64: 1>, scalar_prefetch = 0 : i64, scratch_operands = 1 : i64, tpu.core_type = #tpu.core_type<tc>, window_params = [{transform_indices = @transform_0, window_bounds = array<i64: 8, 32>}, {transform_indices = @transform_1, window_bounds = array<i64: 8, 1>}, {pipeline_mode = #tpu.pipeline_mode<synchronous>, transform_indices = @transform_2, window_bounds = array<i64: 1, 1>}]} {
    %c0_i32 = arith.constant 0 : i32
    %0 = arith.cmpi eq, %arg0, %c0_i32 : i32
    %1 = arith.extui %0 : i1 to i32
    %c0_i32_0 = arith.constant 0 : i32
    %2 = arith.cmpi ne, %1, %c0_i32_0 : i32
    scf.if %2 {
      %cst_19 = arith.constant 0.000000e+00 : f32
      %49 = vector.broadcast %cst_19 : f32 to vector<1x1xf32>
      %c0_20 = arith.constant 0 : index
      %c0_21 = arith.constant 0 : index
      %50 = vector.load %arg4[%c0_20, %c0_21] : memref<1x1xf32, #tpu.memory_space<vmem>>, vector<1x1xf32>
      tpu.vector_store %arg4[%c0_20, %c0_21], %49 {strides = array<i32>} : memref<1x1xf32, #tpu.memory_space<vmem>>, vector<1x1xf32>,
    } else {
    }
    %c0 = arith.constant 0 : index
    %c0_1 = arith.constant 0 : index
    %3 = vector.load %arg1[%c0, %c0_1] : memref<8x32xf32, #tpu.memory_space<vmem>>, vector<8x32xf32>
    %c0_2 = arith.constant 0 : index
    %c0_3 = arith.constant 0 : index
    %4 = vector.load %arg2[%c0_2, %c0_3] : memref<8x1xi32, #tpu.memory_space<vmem>>, vector<8x1xi32>
    %cst = arith.constant dense<0xFF800000> : vector<8xf32>
    %5 = vector.multi_reduction <maximumf>, %3, %cst [1] : vector<8x32xf32> to vector<8xf32>
    %6 = vector.shape_cast %5 : vector<8xf32> to vector<8x1xf32>
    %7 = vector.broadcast %6 : vector<8x1xf32> to vector<8x32xf32>
    %8 = arith.subf %3, %7 : vector<8x32xf32>
    %9 = math.exp %8 : vector<8x32xf32>
    %cst_4 = arith.constant dense<0.000000e+00> : vector<8xf32>
    %10 = vector.multi_reduction <add>, %9, %cst_4 [1] : vector<8x32xf32> to vector<8xf32>
    %11 = vector.shape_cast %10 : vector<8xf32> to vector<8x1xf32>
    %12 = math.log %11 : vector<8x1xf32>
    %13 = tpu.iota {dimensions = array<i32: 1>} : vector<8x32xi32>
    %14 = vector.broadcast %4 : vector<8x1xi32> to vector<8x32xi32>
    %15 = arith.cmpi eq, %13, %14 : vector<8x32xi32>
    %cst_5 = arith.constant 0.000000e+00 : f32
    %16 = vector.broadcast %cst_5 : f32 to vector<8x32xf32>
    %17 = arith.select %15, %8, %16 : vector<8x32xi1>, vector<8x32xf32>
    %cst_6 = arith.constant dense<0.000000e+00> : vector<8xf32>
    %18 = vector.multi_reduction <add>, %17, %cst_6 [1] : vector<8x32xf32> to vector<8xf32>
    %19 = vector.shape_cast %18 : vector<8xf32> to vector<8x1xf32>
    %20 = arith.subf %12, %19 : vector<8x1xf32>
    %cst_7 = arith.constant 0.000000e+00 : f32
    %21 = vector.broadcast %cst_7 : f32 to vector<8x1xf32>
    %22 = arith.subf %21, %20 : vector<8x1xf32>
    %23 = math.exp %22 : vector<8x1xf32>
    %cst_8 = arith.constant 1.000000e+00 : f32
    %24 = vector.broadcast %cst_8 : f32 to vector<8x1xf32>
    %25 = arith.subf %24, %23 : vector<8x1xf32>
    %cst_9 = arith.constant 1.000000e+00 : f32
    %26 = vector.broadcast %cst_9 : f32 to vector<8x1xf32>
    %27 = arith.mulf %26, %25 : vector<8x1xf32>
    %28 = arith.mulf %27, %25 : vector<8x1xf32>
    %29 = arith.mulf %28, %20 : vector<8x1xf32>
    %30 = tpu.iota {dimensions = array<i32: 0>} : vector<8x1xi32>
    %c8_i32 = arith.constant 8 : i32
    %31 = arith.muli %arg0, %c8_i32 : i32
    %32 = vector.broadcast %31 : i32 to vector<8x1xi32>
    %33 = arith.addi %30, %32 : vector<8x1xi32>
    %c8_i32_10 = arith.constant 8 : i32
    %34 = vector.broadcast %c8_i32_10 : i32 to vector<8x1xi32>
    %35 = arith.cmpi slt, %33, %34 : vector<8x1xi32>
    %cst_11 = arith.constant 0.000000e+00 : f32
    %36 = vector.broadcast %cst_11 : f32 to vector<8x1xf32>
    %37 = arith.select %35, %29, %36 : vector<8x1xi1>, vector<8x1xf32>
    %c0_12 = arith.constant 0 : index
    %c0_13 = arith.constant 0 : index
    %38 = vector.load %arg4[%c0_12, %c0_13] : memref<1x1xf32, #tpu.memory_space<vmem>>, vector<1x1xf32>
    %39 = vector.shape_cast %37 : vector<8x1xf32> to vector<1x8x1xf32>
    %cst_14 = arith.constant dense<0.000000e+00> : vector<1xf32>
    %40 = vector.multi_reduction <add>, %39, %cst_14 [1, 2] : vector<1x8x1xf32> to vector<1xf32>
    %41 = vector.shape_cast %40 : vector<1xf32> to vector<1x1x1xf32>
    %42 = vector.extract %41[0, 0, 0] : f32 from vector<1x1x1xf32>
    %43 = vector.broadcast %42 : f32 to vector<1x1xf32>
    %44 = arith.addf %38, %43 : vector<1x1xf32>
    %c0_15 = arith.constant 0 : index
    %c0_16 = arith.constant 0 : index
    %45 = vector.load %arg4[%c0_15, %c0_16] : memref<1x1xf32, #tpu.memory_space<vmem>>, vector<1x1xf32>
    tpu.vector_store %arg4[%c0_15, %c0_16], %44 {strides = array<i32>} : memref<1x1xf32, #tpu.memory_space<vmem>>, vector<1x1xf32>,
    %c0_i32_17 = arith.constant 0 : i32
    %46 = arith.cmpi eq, %arg0, %c0_i32_17 : i32
    %47 = arith.extui %46 : i1 to i32
    %c0_i32_18 = arith.constant 0 : i32
    %48 = arith.cmpi ne, %47, %c0_i32_18 : i32
    scf.if %48 {
      %c0_19 = arith.constant 0 : index
      %c0_20 = arith.constant 0 : index
      %49 = vector.load %arg4[%c0_19, %c0_20] : memref<1x1xf32, #tpu.memory_space<vmem>>, vector<1x1xf32>
      %cst_21 = arith.constant 8.000000e+00 : f32
      %50 = vector.broadcast %cst_21 : f32 to vector<1x1xf32>
      %51 = arith.divf %49, %50 : vector<1x1xf32>
      %c0_22 = arith.constant 0 : index
      %c0_23 = arith.constant 0 : index
      %52 = vector.load %arg3[%c0_22, %c0_23] : memref<1x1xf32, #tpu.memory_space<vmem>>, vector<1x1xf32>
      tpu.vector_store %arg3[%c0_22, %c0_23], %51 {strides = array<i32>} : memref<1x1xf32, #tpu.memory_space<vmem>>, vector<1x1xf32>,
    } else {
    }
    return
  }
  func.func @transform_0(%arg0: i32) -> (i32, i32) {
    %c0_i32 = arith.constant 0 : i32
    %c0_i32_0 = arith.constant 0 : i32
    return %arg0, %c0_i32 : i32, i32
  }
  func.func @transform_1(%arg0: i32) -> (i32, i32) {
    %c0_i32 = arith.constant 0 : i32
    %c0_i32_0 = arith.constant 0 : i32
    return %arg0, %c0_i32 : i32, i32
  }
  func.func @transform_2(%arg0: i32) -> (i32, i32) {
    %c0_i32 = arith.constant 0 : i32
    %c0_i32_0 = arith.constant 0 : i32
    %c0_i32_1 = arith.constant 0 : i32
    return %c0_i32, %c0_i32_0 : i32, i32
  }
}

</mosaic_0001>

<bundles_post_ra>
// kernel: tpu_custom_call.1
= control target key start
LH: loop header
LB: loop body
LE: loop exit
PB: predicated region body
PF: predicated region fallthrough
CT: control target
= control target key end

     0   :  { %vm20_vm0 = vcmask 261120   ;;  %s176_s0 = inlined_call_operand.vmem [shape: f32[8,32], index: 0, kind: input, shape index: {}]   ;;  %s177_s1 = inlined_call_operand.vmem [shape: s32[8,1], index: 1, kind: input, shape index: {}]   ;;  %s178_s2 = inlined_call_operand.hbm [shape: f32[1,1], index: 2, kind: output, shape index: {}]  }
   0x1   :  { %v18_v0 = vld [vmem:[%s176_s0] sm:$0xff] }
   0x2   :  { %7 = vsyncpa [#allocation4], 0  ;;  %v21_v1 = vsel %vm20_vm0, %v18_v0, -inf  ;;  %v142_v2 = vmov 0   ;;  %v19_v3 = vld [vmem:[%s177_s1] sm:$0xff]  ;;  %v32_v9 = vlaneseq  ;;  %vm57_vm2 = vcmask 7168  }
   0x3   :  { %107 = vset.pattern.permute.xlu0 %v142_v2  ;;  %vm16_vm3 = vcmask 0   ;;  %v143_v26 = vmov 0.0   ;;  %v144_v34 = vmov 8.0   ;;  %s145_s1 = smov [#allocation3]   ;;  %s92_s16 = sshll.u32 %s178_s2, 4  ;;  %s93_s16 = int_to_ptr.hbm [resolvable:$true] %s92_s16 }
   0x4   :  { %22 = vmax.xlane.f32.xlu0 %v21_v1  ;;  %v33_v10 = vand.u32 127, %v32_v9  ;;  %17 = vst.msk [vmem:[#allocation2] sm:$0x1] %vm16_vm3, %v143_v26  ;;  %s90_s13 = sshll.u32 %s145_s1, 4  ;;  %s91_s13 = int_to_ptr.vmem [resolvable:$true] %s90_s13 }
   0xb   :  { %v56_v38 = vld [vmem:[#allocation2] sm:$0x1] }
  0x18   :  { %35 = vperm.xlu0 %107, %v19_v3  }
  0x77   :  { %v23_v4 = vpop.xlane.xlu0 %22 }
  0x78   :  { %v24_v5 = vsub.f32 %v18_v0, %v23_v4 }
  0x7a   :  { %v25_v6 = vmul.f32 1.442695, %v24_v5 }
  0x7c   :  { %108 = vpow2.f32 %v25_v6 }
  0x82   :  { %v109_v7 = vpop.eup %108 }
  0x83   :  { %v27_v8 = vsel %vm20_vm0, %v109_v7, 0.0 }
  0x84   :  { %28 = vadd.xlane.f32.xlu1 %v27_v8 }
  0x8a   :  { %v36_v11 = vpop.permute.xlu0 %35 }
  0x8b   :  { %vm37_vm1 = vcmp.eq.s32.totalorder %v33_v10, %v36_v11 }
  0x8c   :  { %v38_v12 = vsel %vm37_vm1, %v24_v5, 0.0 }
  0x8d   :  { %v39_v13 = vsel %vm20_vm0, %v38_v12, 0.0 }
  0x8e   :  { %40 = vadd.xlane.f32.xlu1 %v39_v13 }
  0xf7   :  { %v29_v14 = vpop.xlane.xlu1 %28 }
  0xf8   :  { %110 = vlog2.f32 %v29_v14 }
  0xfe   :  { %v111_v15 = vpop.eup %110 }
  0xff   :  { %v31_v16 = vmul.f32 0.6931472, %v111_v15 }
 0x101   :  { %v41_v17 = vpop.xlane.xlu1 %40 }
 0x102   :  { %v42_v18 = vsub.f32 %v31_v16, %v41_v17 }
 0x104   :  { %v43_v19 = vsub.f32 0.0, %v42_v18 }
 0x106   :  { %v44_v20 = vmul.f32 1.442695, %v43_v19 }
 0x108   :  { %112 = vpow2.f32 %v44_v20 }
 0x109   :  { %114 = vrcp.f32 %v144_v34 }
 0x10e   :  { %v113_v21 = vpop.eup %112 }
 0x10f   :  { %v46_v22 = vsub.f32 1.0, %v113_v21  ;;  %v115_v35 = vpop.eup %114 }
 0x110   :  { %v77_v36 = vmul.f32 8.0, %v115_v35  ;;  %vm81_vm4 = vweird.f32 %v115_v35 }
 0x111   :  { %v47_v23 = vmul.f32 %v46_v22, %v46_v22 }
 0x112   :  { %v78_v37 = vsub.f32 1.0, %v77_v36 }
 0x113   :  { %v48_v24 = vmul.f32 %v47_v23, %v42_v18 }
 0x114   :  { %v79_v40 = vmul.f32 %v115_v35, %v78_v37 }
 0x115   :  { %v58_v25 = vsel %vm57_vm2, %v48_v24, 0.0 }
 0x116   :  { %59 = vadd.xlane.f32.xlu2 %v58_v25  ;;  %v80_v42 = vadd.f32 %v115_v35, %v79_v40 }
 0x118   :  { %v82_v43 = vsel %vm81_vm4, %v115_v35, %v80_v42 }
 0x189   :  { %v60_v27 = vpop.xlane.xlu2 %59 }
 0x18a   :  { %v61_v28 = vrot.slane %v60_v27, 4 }
 0x18c   :  { %v62_v29 = vadd.f32 %v61_v28, %v60_v27 }
 0x18e   :  { %v63_v30 = vrot.slane %v62_v29, 2 }
 0x190   :  { %v64_v31 = vadd.f32 %v63_v30, %v62_v29 }
 0x192   :  { %v65_v32 = vrot.slane %v64_v31, 1 }
 0x194   :  { %v66_v33 = vadd.f32 %v65_v32, %v64_v31 }
 0x196   :  { %101 = vpush %v66_v33 }
 0x1c7   :  { %s102_s0 = spop %101 }
 0x1c8   :  { %v68_v39 = vstv %s102_s0 }
 0x1c9   :  { %v69_v41 = vadd.f32 %v68_v39, %v56_v38 }
 0x1cb   :  { %71 = vst.msk [vmem:[#allocation2] sm:$0x1] %vm16_vm3, %v69_v41 }
 0x1d2   :  { %v75_v44 = vld [vmem:[#allocation2] sm:$0x1] }
 0x1d3   :  { %v83_v45 = vmul.f32 %v82_v43, %v75_v44 }
 0x1d5   :  { %84 = vst.msk [vmem:[#allocation3] sm:$0x1] %vm16_vm3, %v83_v45 }
 0x1d6   :  { %95 = dma.vmem_to_hbm [thread:$0]  %s91_s13, 16, %s93_s16, [#allocation4]  }
 0x1d7   :  { %140 = dma.done.wait [#allocation4], 16  }
 0x1d8   :  { %141 = vsyncadd [#allocation4], 4294967280 }
 0x1d9   :  { %100 = vsyncpa [#allocation4], 1 }

</bundles_post_ra>
